<compile_context>
chip_gen: v7x
topology: tpu7x:2x2x1
jax: 0.10.0
libtpu: 0.0.40
codegen_flags: <defaults>
</compile_context>

<pallas_src>
import jax
import jax.numpy as jnp
import numpy as np
from jax import lax
from jax.experimental import pallas as pl
from jax.experimental.pallas import tpu as pltpu

EPS = 1e-3  # ChannelNorm2D epsilon (module default)


# --------------------------------- kernel --------------------------------------

def fused_residual_kernel(x_ref, m1_ref, m2_ref, aff_ref, red_ref, o_ref, pad_ref):
    # x_ref/o_ref: (H, W*C) channel-folded, lane-dense.
    # m*_ref:      (3, W*C, W*C) banded conv matrices (one per kernel row ky).
    # aff_ref:     (6, W*C) rows = [b1, g1, be1, b2, g2, be2], each tiled over W.
    # red_ref:     (2, W*C, W*C) block-diag reduction mats: [mean (1/C), var (1/(C-1))].
    # pad_ref:     (H+2, W*C) VMEM scratch with 1-row top/bottom halo, reused for both convs.
    H, WC = x_ref.shape
    x = x_ref[...]

    # Zero ONLY the two halo rows (interior is fully overwritten below).  Done every step
    # on purpose: under "parallel" megacore sharding each core has a private scratch.
    zrow = jnp.zeros((1, WC), jnp.float32)
    pad_ref[0:1, :] = zrow
    pad_ref[H + 1:H + 2, :] = zrow
    pad_ref[1:H + 1, :] = x

    avg_mat = red_ref[0]   # per-pixel channel mean, broadcast back over the C lanes
    ssq_mat = red_ref[1]   # unbiased (C-1) channel variance, broadcast back

    def conv3x3(m_ref, bias_row):
        # 3x3 conv = sum over ky of (shifted rows) @ banded(ky); kx taps, channel mixing
        # and left/right zero padding are folded into the banded matrices.
        acc = jnp.dot(pad_ref[0:H, :], m_ref[0], preferred_element_type=jnp.float32)
        acc = acc + jnp.dot(pad_ref[1:H + 1, :], m_ref[1], preferred_element_type=jnp.float32)
        acc = acc + jnp.dot(pad_ref[2:H + 2, :], m_ref[2], preferred_element_type=jnp.float32)
        return acc + bias_row

    def channel_norm(y, gamma_row, beta_row):
        # ChannelNorm2D in the folded layout: block-diag matmuls give the per-pixel
        # channel mean / unbiased variance already broadcast across the C lanes.
        mean = jnp.dot(y, avg_mat, preferred_element_type=jnp.float32)
        diff = y - mean
        var = jnp.dot(diff * diff, ssq_mat, preferred_element_type=jnp.float32)
        return gamma_row * (diff * lax.rsqrt(var + EPS)) + beta_row

    # conv1 -> ChannelNorm -> ReLU   (intermediate never leaves VMEM/vregs)
    y = jnp.maximum(
        channel_norm(conv3x3(m1_ref, aff_ref[0:1, :]), aff_ref[1:2, :], aff_ref[2:3, :]),
        0.0)

    # Re-pad the interior for conv2 (halo rows are still zero).
    pad_ref[1:H + 1, :] = y

    # conv2 -> ChannelNorm -> residual skip, lane-dense output store.
    z = channel_norm(conv3x3(m2_ref, aff_ref[3:4, :]), aff_ref[4:5, :], aff_ref[5:6, :])
    o_ref[...] = (x + z).astype(o_ref.dtype)


# --------------------------------- wrapper --------------------------------------

def residual_block_nchw(x_nchw, params):
    """x_nchw: (N, C, H, W) float32 (PyTorch layout). params from pack_params()."""
    m1, m2, aff, red = params
    N, C, H, W = x_nchw.shape
    WC = W * C

    # NCHW -> channel-folded lane-dense (N, H, W*C); inverse applied on the way out.
    x_fold = jnp.transpose(x_nchw, (0, 2, 3, 1)).reshape(N, H, WC)

    act_spec = pl.BlockSpec((None, H, WC), lambda n: (n, 0, 0))
    const3 = lambda a: pl.BlockSpec(a.shape, lambda n: (0, 0, 0))  # DMA'd once
    const2 = lambda a: pl.BlockSpec(a.shape, lambda n: (0, 0))

    out = pl.pallas_call(
        fused_residual_kernel,
        out_shape=jax.ShapeDtypeStruct((N, H, WC), jnp.float32),
        grid=(N,),
        in_specs=[act_spec, const3(m1), const3(m2), const2(aff), const3(red)],
        out_specs=pl.BlockSpec((None, H, WC), lambda n: (n, 0, 0)),
        scratch_shapes=[pltpu.VMEM((H + 2, WC), jnp.float32)],
        compiler_params=pltpu.CompilerParams(dimension_semantics=("parallel",)),
    )(x_fold, m1, m2, aff, red)

    return jnp.transpose(out.reshape(N, H, W, C), (0, 3, 1, 2))


# --------------------------- host-side parameter packing ------------------------

def _conv_weight_to_banded(w_oihw, W):
    """OIHW (Cout, Cin, 3, 3) conv weight -> (3, W*C, W*C) banded matrices.

    m[ky][w_src*C + ci, w_out*C + co] = w[co, ci, ky, kx] with kx = w_src - w_out + 1,
    entries for out-of-range w_src omitted (implements the left/right zero padding)."""
    C = w_oihw.shape[0]
    WC = W * C
    w = np.asarray(w_oihw, np.float32)
    m = np.zeros((3, WC, WC), np.float32)
    for ky in range(3):
        for kx in range(3):
            blk = w[:, :, ky, kx].T  # (ci, co)
            for w_out in range(W):
                w_src = w_out + kx - 1
                if 0 <= w_src < W:
                    m[ky, w_src * C:(w_src + 1) * C, w_out * C:(w_out + 1) * C] = blk
    return jnp.asarray(m)


def pack_params(w1, b1, g1, be1, w2, b2, g2, be2, *, W):
    C = b1.shape[0]
    m1 = _conv_weight_to_banded(w1, W)
    m2 = _conv_weight_to_banded(w2, W)
    fold = lambda v: jnp.tile(v, W)  # (C,) -> (W*C,), lane w*C+c holds v[c]
    aff = jnp.stack([fold(b1), fold(g1), fold(be1), fold(b2), fold(g2), fold(be2)])
    avg = np.kron(np.eye(W, dtype=np.float32), np.ones((C, C), np.float32) / C)
    ssq = np.kron(np.eye(W, dtype=np.float32), np.ones((C, C), np.float32) / (C - 1))
    red = jnp.asarray(np.stack([avg, ssq]))
    return m1, m2, aff, red


# ------------------------------ pure-JAX reference ------------------------------

def ref_residual_block(x_nchw, w1, b1, g1, be1, w2, b2, g2, be2):
    def conv(v, w, b):
        y = lax.conv_general_dilated(v, w, (1, 1), ((1, 1), (1, 1)),
                                     dimension_numbers=('NCHW', 'OIHW', 'NCHW'),
                                     precision=lax.Precision.HIGHEST)
        return y + b.reshape(1, -1, 1, 1)

    def cnorm(y, g, be):
        C = y.shape[1]
        mean = jnp.mean(y, axis=1, keepdims=True)
        var = jnp.sum((y - mean) ** 2, axis=1, keepdims=True) / (C - 1)  # torch.var unbiased
        return (g.reshape(1, -1, 1, 1) * ((y - mean) * lax.rsqrt(var + EPS))
                + be.reshape(1, -1, 1, 1))

    y = jnp.maximum(cnorm(conv(x_nchw, w1, b1), g1, be1), 0.0)
    y = cnorm(conv(y, w2, b2), g2, be2)
    return x_nchw + y


# ----------------------------------- main ---------------------------------------

if __name__ == "__main__":
    key = jax.random.PRNGKey(0)
    N, C, H, W = 2, 4, 16, 16  # PyTorch NCHW input: (2, 4, 16, 16)
    ks = jax.random.split(key, 9)

    x_nchw = jax.random.normal(ks[0], (N, C, H, W), jnp.float32)

    # Conv2d weights (OIHW) + biases; ChannelNorm affine params (perturbed from the
    # gamma=1 / beta=0 init so the affine path is actually exercised).
    w1 = 0.1 * jax.random.normal(ks[1], (C, C, 3, 3), jnp.float32)
    w2 = 0.1 * jax.random.normal(ks[2], (C, C, 3, 3), jnp.float32)
    b1 = 0.1 * jax.random.normal(ks[3], (C,), jnp.float32)
    b2 = 0.1 * jax.random.normal(ks[4], (C,), jnp.float32)
    g1 = 1.0 + 0.1 * jax.random.normal(ks[5], (C,), jnp.float32)
    g2 = 1.0 + 0.1 * jax.random.normal(ks[6], (C,), jnp.float32)
    be1 = 0.1 * jax.random.normal(ks[7], (C,), jnp.float32)
    be2 = 0.1 * jax.random.normal(ks[8], (C,), jnp.float32)

    params = pack_params(w1, b1, g1, be1, w2, b2, g2, be2, W=W)

    out = jax.block_until_ready(residual_block_nchw(x_nchw, params))
    ref = ref_residual_block(x_nchw, w1, b1, g1, be1, w2, b2, g2, be2)
    np.testing.assert_allclose(np.asarray(out), np.asarray(ref), atol=1e-3, rtol=1e-3)
    print("KERNEL_OK")
</pallas_src>

<mosaic_0001>
module attributes {stable_mosaic.version = 11 : i64} {
  func.func @fused_residual_kernel(%arg0: i32, %arg1: memref<1x16x64xf32, #tpu.memory_space<vmem>>, %arg2: memref<3x64x64xf32, #tpu.memory_space<vmem>>, %arg3: memref<3x64x64xf32, #tpu.memory_space<vmem>>, %arg4: memref<6x64xf32, #tpu.memory_space<vmem>>, %arg5: memref<2x64x64xf32, #tpu.memory_space<vmem>>, %arg6: memref<1x16x64xf32, #tpu.memory_space<vmem>>, %arg7: memref<18x64xf32, #tpu.memory_space<vmem>>) attributes {dimension_semantics = [#tpu.dimension_semantics<parallel>], iteration_bounds = array<i64: 2>, scalar_prefetch = 0 : i64, scratch_operands = 1 : i64, tpu.core_type = #tpu.core_type<tc>, window_params = [{transform_indices = @transform_0, window_bounds = array<i64: 1, 16, 64>}, {pipeline_mode = #tpu.pipeline_mode<synchronous>, transform_indices = @transform_1, window_bounds = array<i64: 3, 64, 64>}, {pipeline_mode = #tpu.pipeline_mode<synchronous>, transform_indices = @transform_2, window_bounds = array<i64: 3, 64, 64>}, {pipeline_mode = #tpu.pipeline_mode<synchronous>, transform_indices = @transform_3, window_bounds = array<i64: 6, 64>}, {pipeline_mode = #tpu.pipeline_mode<synchronous>, transform_indices = @transform_4, window_bounds = array<i64: 2, 64, 64>}, {transform_indices = @transform_5, window_bounds = array<i64: 1, 16, 64>}]} {
    %c0 = arith.constant 0 : index
    %c0_0 = arith.constant 0 : index
    %c0_1 = arith.constant 0 : index
    %0 = vector.load %arg1[%c0, %c0_0, %c0_1] : memref<1x16x64xf32, #tpu.memory_space<vmem>>, vector<1x16x64xf32>
    %1 = vector.shape_cast %0 : vector<1x16x64xf32> to vector<16x64xf32>
    %cst = arith.constant 0.000000e+00 : f32
    %2 = vector.broadcast %cst : f32 to vector<1x64xf32>
    %c0_2 = arith.constant 0 : index
    %c0_3 = arith.constant 0 : index
    %3 = vector.load %arg7[%c0_2, %c0_3] : memref<18x64xf32, #tpu.memory_space<vmem>>, vector<1x64xf32>
    tpu.vector_store %arg7[%c0_2, %c0_3], %2 {strides = array<i32>} : memref<18x64xf32, #tpu.memory_space<vmem>>, vector<1x64xf32>,
    %c17 = arith.constant 17 : index
    %c0_4 = arith.constant 0 : index
    %4 = vector.load %arg7[%c17, %c0_4] : memref<18x64xf32, #tpu.memory_space<vmem>>, vector<1x64xf32>
    tpu.vector_store %arg7[%c17, %c0_4], %2 {strides = array<i32>} : memref<18x64xf32, #tpu.memory_space<vmem>>, vector<1x64xf32>,
    %c1 = arith.constant 1 : index
    %c0_5 = arith.constant 0 : index
    %5 = vector.load %arg7[%c1, %c0_5] : memref<18x64xf32, #tpu.memory_space<vmem>>, vector<16x64xf32>
    tpu.vector_store %arg7[%c1, %c0_5], %1 {strides = array<i32>} : memref<18x64xf32, #tpu.memory_space<vmem>>, vector<16x64xf32>,
    %c0_6 = arith.constant 0 : index
    %c0_7 = arith.constant 0 : index
    %c0_8 = arith.constant 0 : index
    %6 = vector.load %arg5[%c0_6, %c0_7, %c0_8] : memref<2x64x64xf32, #tpu.memory_space<vmem>>, vector<1x64x64xf32>
    %7 = vector.shape_cast %6 : vector<1x64x64xf32> to vector<64x64xf32>
    %c1_9 = arith.constant 1 : index
    %c0_10 = arith.constant 0 : index
    %c0_11 = arith.constant 0 : index
    %8 = vector.load %arg5[%c1_9, %c0_10, %c0_11] : memref<2x64x64xf32, #tpu.memory_space<vmem>>, vector<1x64x64xf32>
    %9 = vector.shape_cast %8 : vector<1x64x64xf32> to vector<64x64xf32>
    %c0_12 = arith.constant 0 : index
    %c0_13 = arith.constant 0 : index
    %10 = vector.load %arg4[%c0_12, %c0_13] : memref<6x64xf32, #tpu.memory_space<vmem>>, vector<1x64xf32>
    %c0_14 = arith.constant 0 : index
    %c0_15 = arith.constant 0 : index
    %11 = vector.load %arg7[%c0_14, %c0_15] : memref<18x64xf32, #tpu.memory_space<vmem>>, vector<16x64xf32>
    %c0_16 = arith.constant 0 : index
    %c0_17 = arith.constant 0 : index
    %c0_18 = arith.constant 0 : index
    %12 = vector.load %arg2[%c0_16, %c0_17, %c0_18] : memref<3x64x64xf32, #tpu.memory_space<vmem>>, vector<1x64x64xf32>
    %13 = vector.shape_cast %12 : vector<1x64x64xf32> to vector<64x64xf32>
    %cst_19 = arith.constant dense<0.000000e+00> : vector<16x64xf32>
    %14 = tpu.matmul %11, %13, %cst_19 {dimension_numbers = #tpu.dot_dimension_numbers<[1], [0], [0], [1], [0, 0, 1, 1], [], []>} : vector<16x64xf32>, vector<64x64xf32>, vector<16x64xf32> -> vector<16x64xf32>
    %c1_20 = arith.constant 1 : index
    %c0_21 = arith.constant 0 : index
    %15 = vector.load %arg7[%c1_20, %c0_21] : memref<18x64xf32, #tpu.memory_space<vmem>>, vector<16x64xf32>
    %c1_22 = arith.constant 1 : index
    %c0_23 = arith.constant 0 : index
    %c0_24 = arith.constant 0 : index
    %16 = vector.load %arg2[%c1_22, %c0_23, %c0_24] : memref<3x64x64xf32, #tpu.memory_space<vmem>>, vector<1x64x64xf32>
    %17 = vector.shape_cast %16 : vector<1x64x64xf32> to vector<64x64xf32>
    %cst_25 = arith.constant dense<0.000000e+00> : vector<16x64xf32>
    %18 = tpu.matmul %15, %17, %cst_25 {dimension_numbers = #tpu.dot_dimension_numbers<[1], [0], [0], [1], [0, 0, 1, 1], [], []>} : vector<16x64xf32>, vector<64x64xf32>, vector<16x64xf32> -> vector<16x64xf32>
    %19 = arith.addf %14, %18 : vector<16x64xf32>
    %c2 = arith.constant 2 : index
    %c0_26 = arith.constant 0 : index
    %20 = vector.load %arg7[%c2, %c0_26] : memref<18x64xf32, #tpu.memory_space<vmem>>, vector<16x64xf32>
    %c2_27 = arith.constant 2 : index
    %c0_28 = arith.constant 0 : index
    %c0_29 = arith.constant 0 : index
    %21 = vector.load %arg2[%c2_27, %c0_28, %c0_29] : memref<3x64x64xf32, #tpu.memory_space<vmem>>, vector<1x64x64xf32>
    %22 = vector.shape_cast %21 : vector<1x64x64xf32> to vector<64x64xf32>
    %cst_30 = arith.constant dense<0.000000e+00> : vector<16x64xf32>
    %23 = tpu.matmul %20, %22, %cst_30 {dimension_numbers = #tpu.dot_dimension_numbers<[1], [0], [0], [1], [0, 0, 1, 1], [], []>} : vector<16x64xf32>, vector<64x64xf32>, vector<16x64xf32> -> vector<16x64xf32>
    %24 = arith.addf %19, %23 : vector<16x64xf32>
    %25 = vector.broadcast %10 : vector<1x64xf32> to vector<16x64xf32>
    %26 = arith.addf %24, %25 : vector<16x64xf32>
    %c1_31 = arith.constant 1 : index
    %c0_32 = arith.constant 0 : index
    %27 = vector.load %arg4[%c1_31, %c0_32] : memref<6x64xf32, #tpu.memory_space<vmem>>, vector<1x64xf32>
    %c2_33 = arith.constant 2 : index
    %c0_34 = arith.constant 0 : index
    %28 = vector.load %arg4[%c2_33, %c0_34] : memref<6x64xf32, #tpu.memory_space<vmem>>, vector<1x64xf32>
    %cst_35 = arith.constant dense<0.000000e+00> : vector<16x64xf32>
    %29 = tpu.matmul %26, %7, %cst_35 {dimension_numbers = #tpu.dot_dimension_numbers<[1], [0], [0], [1], [0, 0, 1, 1], [], []>} : vector<16x64xf32>, vector<64x64xf32>, vector<16x64xf32> -> vector<16x64xf32>
    %30 = arith.subf %26, %29 : vector<16x64xf32>
    %31 = arith.mulf %30, %30 : vector<16x64xf32>
    %cst_36 = arith.constant dense<0.000000e+00> : vector<16x64xf32>
    %32 = tpu.matmul %31, %9, %cst_36 {dimension_numbers = #tpu.dot_dimension_numbers<[1], [0], [0], [1], [0, 0, 1, 1], [], []>} : vector<16x64xf32>, vector<64x64xf32>, vector<16x64xf32> -> vector<16x64xf32>
    %cst_37 = arith.constant 1.000000e-03 : f32
    %33 = vector.broadcast %cst_37 : f32 to vector<16x64xf32>
    %34 = arith.addf %32, %33 : vector<16x64xf32>
    %35 = math.rsqrt %34 : vector<16x64xf32>
    %36 = arith.mulf %30, %35 : vector<16x64xf32>
    %37 = vector.broadcast %27 : vector<1x64xf32> to vector<16x64xf32>
    %38 = arith.mulf %37, %36 : vector<16x64xf32>
    %39 = vector.broadcast %28 : vector<1x64xf32> to vector<16x64xf32>
    %40 = arith.addf %38, %39 : vector<16x64xf32>
    %cst_38 = arith.constant 0.000000e+00 : f32
    %41 = vector.broadcast %cst_38 : f32 to vector<16x64xf32>
    %42 = arith.maximumf %40, %41 : vector<16x64xf32>
    %c1_39 = arith.constant 1 : index
    %c0_40 = arith.constant 0 : index
    %43 = vector.load %arg7[%c1_39, %c0_40] : memref<18x64xf32, #tpu.memory_space<vmem>>, vector<16x64xf32>
    tpu.vector_store %arg7[%c1_39, %c0_40], %42 {strides = array<i32>} : memref<18x64xf32, #tpu.memory_space<vmem>>, vector<16x64xf32>,
    %c3 = arith.constant 3 : index
    %c0_41 = arith.constant 0 : index
    %44 = vector.load %arg4[%c3, %c0_41] : memref<6x64xf32, #tpu.memory_space<vmem>>, vector<1x64xf32>
    %c0_42 = arith.constant 0 : index
    %c0_43 = arith.constant 0 : index
    %45 = vector.load %arg7[%c0_42, %c0_43] : memref<18x64xf32, #tpu.memory_space<vmem>>, vector<16x64xf32>
    %c0_44 = arith.constant 0 : index
    %c0_45 = arith.constant 0 : index
    %c0_46 = arith.constant 0 : index
    %46 = vector.load %arg3[%c0_44, %c0_45, %c0_46] : memref<3x64x64xf32, #tpu.memory_space<vmem>>, vector<1x64x64xf32>
    %47 = vector.shape_cast %46 : vector<1x64x64xf32> to vector<64x64xf32>
    %cst_47 = arith.constant dense<0.000000e+00> : vector<16x64xf32>
    %48 = tpu.matmul %45, %47, %cst_47 {dimension_numbers = #tpu.dot_dimension_numbers<[1], [0], [0], [1], [0, 0, 1, 1], [], []>} : vector<16x64xf32>, vector<64x64xf32>, vector<16x64xf32> -> vector<16x64xf32>
    %c1_48 = arith.constant 1 : index
    %c0_49 = arith.constant 0 : index
    %49 = vector.load %arg7[%c1_48, %c0_49] : memref<18x64xf32, #tpu.memory_space<vmem>>, vector<16x64xf32>
    %c1_50 = arith.constant 1 : index
    %c0_51 = arith.constant 0 : index
    %c0_52 = arith.constant 0 : index
    %50 = vector.load %arg3[%c1_50, %c0_51, %c0_52] : memref<3x64x64xf32, #tpu.memory_space<vmem>>, vector<1x64x64xf32>
    %51 = vector.shape_cast %50 : vector<1x64x64xf32> to vector<64x64xf32>
    %cst_53 = arith.constant dense<0.000000e+00> : vector<16x64xf32>
    %52 = tpu.matmul %49, %51, %cst_53 {dimension_numbers = #tpu.dot_dimension_numbers<[1], [0], [0], [1], [0, 0, 1, 1], [], []>} : vector<16x64xf32>, vector<64x64xf32>, vector<16x64xf32> -> vector<16x64xf32>
    %53 = arith.addf %48, %52 : vector<16x64xf32>
    %c2_54 = arith.constant 2 : index
    %c0_55 = arith.constant 0 : index
    %54 = vector.load %arg7[%c2_54, %c0_55] : memref<18x64xf32, #tpu.memory_space<vmem>>, vector<16x64xf32>
    %c2_56 = arith.constant 2 : index
    %c0_57 = arith.constant 0 : index
    %c0_58 = arith.constant 0 : index
    %55 = vector.load %arg3[%c2_56, %c0_57, %c0_58] : memref<3x64x64xf32, #tpu.memory_space<vmem>>, vector<1x64x64xf32>
    %56 = vector.shape_cast %55 : vector<1x64x64xf32> to vector<64x64xf32>
    %cst_59 = arith.constant dense<0.000000e+00> : vector<16x64xf32>
    %57 = tpu.matmul %54, %56, %cst_59 {dimension_numbers = #tpu.dot_dimension_numbers<[1], [0], [0], [1], [0, 0, 1, 1], [], []>} : vector<16x64xf32>, vector<64x64xf32>, vector<16x64xf32> -> vector<16x64xf32>
    %58 = arith.addf %53, %57 : vector<16x64xf32>
    %59 = vector.broadcast %44 : vector<1x64xf32> to vector<16x64xf32>
    %60 = arith.addf %58, %59 : vector<16x64xf32>
    %c4 = arith.constant 4 : index
    %c0_60 = arith.constant 0 : index
    %61 = vector.load %arg4[%c4, %c0_60] : memref<6x64xf32, #tpu.memory_space<vmem>>, vector<1x64xf32>
    %c5 = arith.constant 5 : index
    %c0_61 = arith.constant 0 : index
    %62 = vector.load %arg4[%c5, %c0_61] : memref<6x64xf32, #tpu.memory_space<vmem>>, vector<1x64xf32>
    %cst_62 = arith.constant dense<0.000000e+00> : vector<16x64xf32>
    %63 = tpu.matmul %60, %7, %cst_62 {dimension_numbers = #tpu.dot_dimension_numbers<[1], [0], [0], [1], [0, 0, 1, 1], [], []>} : vector<16x64xf32>, vector<64x64xf32>, vector<16x64xf32> -> vector<16x64xf32>
    %64 = arith.subf %60, %63 : vector<16x64xf32>
    %65 = arith.mulf %64, %64 : vector<16x64xf32>
    %cst_63 = arith.constant dense<0.000000e+00> : vector<16x64xf32>
    %66 = tpu.matmul %65, %9, %cst_63 {dimension_numbers = #tpu.dot_dimension_numbers<[1], [0], [0], [1], [0, 0, 1, 1], [], []>} : vector<16x64xf32>, vector<64x64xf32>, vector<16x64xf32> -> vector<16x64xf32>
    %cst_64 = arith.constant 1.000000e-03 : f32
    %67 = vector.broadcast %cst_64 : f32 to vector<16x64xf32>
    %68 = arith.addf %66, %67 : vector<16x64xf32>
    %69 = math.rsqrt %68 : vector<16x64xf32>
    %70 = arith.mulf %64, %69 : vector<16x64xf32>
    %71 = vector.broadcast %61 : vector<1x64xf32> to vector<16x64xf32>
    %72 = arith.mulf %71, %70 : vector<16x64xf32>
    %73 = vector.broadcast %62 : vector<1x64xf32> to vector<16x64xf32>
    %74 = arith.addf %72, %73 : vector<16x64xf32>
    %75 = arith.addf %1, %74 : vector<16x64xf32>
    %c0_65 = arith.constant 0 : index
    %c0_66 = arith.constant 0 : index
    %c0_67 = arith.constant 0 : index
    %76 = vector.load %arg6[%c0_65, %c0_66, %c0_67] : memref<1x16x64xf32, #tpu.memory_space<vmem>>, vector<1x16x64xf32>
    %77 = vector.shape_cast %76 : vector<1x16x64xf32> to vector<16x64xf32>
    %78 = vector.shape_cast %75 : vector<16x64xf32> to vector<1x16x64xf32>
    tpu.vector_store %arg6[%c0_65, %c0_66, %c0_67], %78 {strides = array<i32>} : memref<1x16x64xf32, #tpu.memory_space<vmem>>, vector<1x16x64xf32>,
    return
  }
  func.func @transform_0(%arg0: i32) -> (i32, i32, i32) {
    %c0_i32 = arith.constant 0 : i32
    %c0_i32_0 = arith.constant 0 : i32
    %c0_i32_1 = arith.constant 0 : i32
    return %arg0, %c0_i32, %c0_i32_0 : i32, i32, i32
  }
  func.func @transform_1(%arg0: i32) -> (i32, i32, i32) {
    %c0_i32 = arith.constant 0 : i32
    %c0_i32_0 = arith.constant 0 : i32
    %c0_i32_1 = arith.constant 0 : i32
    %c0_i32_2 = arith.constant 0 : i32
    return %c0_i32, %c0_i32_0, %c0_i32_1 : i32, i32, i32
  }
  func.func @transform_2(%arg0: i32) -> (i32, i32, i32) {
    %c0_i32 = arith.constant 0 : i32
    %c0_i32_0 = arith.constant 0 : i32
    %c0_i32_1 = arith.constant 0 : i32
    %c0_i32_2 = arith.constant 0 : i32
    return %c0_i32, %c0_i32_0, %c0_i32_1 : i32, i32, i32
  }
  func.func @transform_3(%arg0: i32) -> (i32, i32) {
    %c0_i32 = arith.constant 0 : i32
    %c0_i32_0 = arith.constant 0 : i32
    %c0_i32_1 = arith.constant 0 : i32
    return %c0_i32, %c0_i32_0 : i32, i32
  }
  func.func @transform_4(%arg0: i32) -> (i32, i32, i32) {
    %c0_i32 = arith.constant 0 : i32
    %c0_i32_0 = arith.constant 0 : i32
    %c0_i32_1 = arith.constant 0 : i32
    %c0_i32_2 = arith.constant 0 : i32
    return %c0_i32, %c0_i32_0, %c0_i32_1 : i32, i32, i32
  }
  func.func @transform_5(%arg0: i32) -> (i32, i32, i32) {
    %c0_i32 = arith.constant 0 : i32
    %c0_i32_0 = arith.constant 0 : i32
    %c0_i32_1 = arith.constant 0 : i32
    return %arg0, %c0_i32, %c0_i32_0 : i32, i32, i32
  }
}

</mosaic_0001>

<bundles_post_ra>
// kernel: tpu_custom_call.1
= control target key start
LH: loop header
LB: loop body
LE: loop exit
PB: predicated region body
PF: predicated region fallthrough
CT: control target
= control target key end

     0   :  { %10 = vsyncpa [#allocation4], 0  ;;  %s2561_s0 = inlined_call_operand.hbm [shape: f32[2,16,64], index: 0, kind: input, shape index: {}]   ;;  %s2562_s1 = inlined_call_operand.hbm [shape: f32[3,64,64], index: 1, kind: input, shape index: {}]   ;;  %s2563_s2 = inlined_call_operand.hbm [shape: f32[3,64,64], index: 2, kind: input, shape index: {}]   ;;  %s2564_s3 = inlined_call_operand.vmem [shape: f32[6,64], index: 3, kind: input, shape index: {}]   ;;  %s2565_s4 = inlined_call_operand.hbm [shape: f32[2,64,64], index: 4, kind: input, shape index: {}]   ;;  %s2566_s5 = inlined_call_operand.hbm [shape: f32[2,16,64], index: 5, kind: output, shape index: {}]  }
   0x1   :  { %12 = vsyncpa [#allocation4 + $0x1], 0 }
   0x2   :  { %13 = vsyncpa [#allocation7], 0 }
   0x3   :  { %14 = vsyncpa [#allocation10], 0 }
   0x4   :  { %15 = vsyncpa [#allocation5], 0 }
   0x5   :  { %17 = vsyncpa [#allocation5 + $0x1], 0  ;;  %s2198_s18 = smov 0   ;;  %s2200_s19 = smov 0  }
   0x6   :  { %s2202_s20 = smov 0   ;;  %s2204_s21 = smov 0  }
   0x7 LB: > { %s2219_s22 = sadd.s32 4294967295, %s2156_s21   ;;  %s1372_s23 = sadd.s32 4294967294, %s2156_s21   ;;  %s2156_s21 = sphi %s2204_s21, %s2589_s21   ;;  %s2152_s20 = sphi %s2202_s20, %s2588_s20   ;;  %s2148_s19 = sphi %s2200_s19, %s2587_s19   ;;  %s2144_s18 = sphi %s2198_s18, %s2586_s18  }
   0x8   : > { %p43_p0 = scmp.ne.s32.totalorder %s2148_s19, %s2144_s18  ;;  %p2567_p1 = scmp.eq.s32.totalorder %s2219_s22, 0 }
   0x9   : > { %p157_p3 = scmp.eq.s32.totalorder %s1372_s23, 1  ;;  %p1373_p5 = scmp.ge.s32.totalorder %s2156_s21, 1 }
   0xa   : > { %p2228_p4 = por %p2567_p1, %p43_p0  ;;  %p164_p7 = scmp.lt.s32.totalorder %s2156_s21, 3 }
   0xb   : > { %p2233_p6 = por %p157_p3, %p43_p0  ;;  %s2158_s27 = smov [#allocation6]  }
   0xc   : > { %s2570_s24 = scalar_select %p2228_p4, 1, 0 }
   0xd   : > { %s2571_s25 = scalar_select %p2233_p6, 1, 0 }
   0xe   : > { %p2238_p8 = pnand %p1373_p5, %p164_p7  ;;  %s176_s28 = sshll.u32 %s2158_s27, 4  ;;  %s2242_s28 = int_to_ptr.vmem [resolvable:$true] %s176_s28 }
   0xf   : > { %s2159_s30 = smov [#allocation8]   ;;  %s2160_s7 = smov [#allocation9]  }
  0x10   : > { %s2572_s26 = scalar_select %p2238_p8, 1, 0 }
  0x11   : > { %p1894_p9 = pneg %p2238_p8  ;;  %s189_s6 = sshll.u32 %s2159_s30, 4  ;;  %s2253_s6 = int_to_ptr.vmem [resolvable:$true] %s189_s6 }
  0x12   : > { %s2255_s8 = sshll.u32 %s2160_s7, 4  ;;  %s1968_s11 = scalar_lea.hbm %s2562_s1, 3072  ;;  %s206_s8 = int_to_ptr.vmem [resolvable:$true] %s2255_s8 }
  0x13   : > { %p2249_p11 = pnand %p1894_p9, %p2567_p1  ;;  %p1969_p12 = scmp.ne.s32.totalorder %s2562_s1, %s1968_s11 }
  0x14   : > { %p1975_p5 = scmp.lt.u32.totalorder %s1968_s11, %s2562_s1 }
  0x15   : > { %p2265_p13 = pneg %p2249_p11 }
  0x17   : > { %p1971_p0 = pnand %p2265_p13, %p1969_p12 }
  0x19   : > { %p1972_p3 = pneg %p1971_p0 }
  0x1b   : > { %p1977_p7 = pnand %p1975_p5, %p1972_p3 }
  0x1d   : > { %1980 = shalt.err (!%p1977_p7)
}
  0x1e   : > { %s1981_s17 = scalar_lea.vmem %s2242_s28, 3072  ;;  %p1989_p2 = scmp.lt.s32.totalorder %s2242_s28, %s2242_s28 }
  0x1f   : > { %p1982_p9 = scmp.ne.s32.totalorder %s2242_s28, %s1981_s17  ;;  %p1990_p6 = scmp.lt.s32.totalorder %s1981_s17, %s1981_s17 }
  0x21   : > { %p1984_p10 = pnand %p1982_p9, %p2265_p13  ;;  %p1991_p12 = por %p1990_p6, %p1989_p2 }
  0x23   : > { %p1985_p1 = pneg %p1984_p10 }
  0x25   : > { %p1992_p0 = pnand %p1991_p12, %p1985_p1 }
  0x27   : > { %1995 = shalt.err (!%p1992_p0)
}
  0x28   : > { %s2161_s23 = smov 128   ;;  %s2162_s27 = smov 8  }
  0x29   : > { %1897 = dma.hbm_to_vmem [thread:$0]  (!%p2249_p11), %s2562_s1, 3072, %s2242_s28, [#allocation7], %s2161_s23, %s2161_s23, %s2162_s27  }
  0x2a   : > { %s1996_s11 = scalar_lea.hbm %s2563_s2, 3072 }
  0x2b   : > { %p1997_p1 = scmp.ne.s32.totalorder %s2563_s2, %s1996_s11  ;;  %p2003_p10 = scmp.lt.u32.totalorder %s1996_s11, %s2563_s2 }
  0x2d   : > { %p1999_p2 = pnand %p1997_p1, %p2265_p13 }
  0x2f   : > { %p2000_p6 = pneg %p1999_p2 }
  0x31   : > { %p2005_p3 = pnand %p2003_p10, %p2000_p6 }
  0x33   : > { %2008 = shalt.err (!%p2005_p3)
}
  0x34   : > { %s2009_s28 = scalar_lea.vmem %s2253_s6, 3072  ;;  %p2017_p12 = scmp.lt.s32.totalorder %s2253_s6, %s2253_s6 }
  0x35   : > { %p2010_p5 = scmp.ne.s32.totalorder %s2253_s6, %s2009_s28  ;;  %p2018_p0 = scmp.lt.s32.totalorder %s2009_s28, %s2009_s28 }
  0x37   : > { %p2012_p7 = pnand %p2010_p5, %p2265_p13  ;;  %p2019_p1 = por %p2018_p0, %p2017_p12 }
  0x39   : > { %p2013_p9 = pneg %p2012_p7 }
  0x3b   : > { %p2020_p2 = pnand %p2019_p1, %p2013_p9 }
  0x3d   : > { %2023 = shalt.err (!%p2020_p2)
}
  0x3e   : > { %1900 = dma.hbm_to_vmem [thread:$0]  (!%p2249_p11), %s2563_s2, 3072, %s2253_s6, [#allocation7], %s2161_s23, %s2161_s23, %s2162_s27  }
  0x3f   : > { %s2024_s10 = scalar_lea.hbm %s2565_s4, 2048 }
  0x40   : > { %p2025_p6 = scmp.ne.s32.totalorder %s2565_s4, %s2024_s10  ;;  %p2031_p5 = scmp.lt.u32.totalorder %s2024_s10, %s2565_s4 }
  0x42   : > { %p2027_p10 = pnand %p2025_p6, %p2265_p13 }
  0x44   : > { %p2028_p3 = pneg %p2027_p10 }
  0x46   : > { %p2033_p7 = pnand %p2031_p5, %p2028_p3 }
  0x48   : > { %2036 = shalt.err (!%p2033_p7)
}
  0x49   : > { %s2037_s16 = scalar_lea.vmem %s206_s8, 2048  ;;  %p2045_p1 = scmp.lt.s32.totalorder %s206_s8, %s206_s8 }
  0x4a   : > { %p2038_p9 = scmp.ne.s32.totalorder %s206_s8, %s2037_s16  ;;  %p2046_p2 = scmp.lt.s32.totalorder %s2037_s16, %s2037_s16 }
  0x4c   : > { %p2040_p12 = pnand %p2038_p9, %p2265_p13  ;;  %p2047_p4 = por %p2046_p2, %p2045_p1 }
  0x4e   : > { %p2041_p0 = pneg %p2040_p12 }
  0x50   : > { %p2048_p8 = pnand %p2047_p4, %p2041_p0 }
  0x52   : > { %2051 = shalt.err (!%p2048_p8)
}
  0x53   : > { %1903 = dma.hbm_to_vmem [thread:$0]  (!%p2249_p11), %s2565_s4, 2048, %s206_s8, [#allocation10], %s2161_s23, %s2161_s23, %s2162_s27  }
  0x54   : > { %s2338_s14 = sadd.s32 1, %s2156_s21   ;;  %s30_s17 = sadd.s32 1, %s2152_s20 }
  0x55   : > { %s27_s29 = ssub.s32 %s2156_s21, %s2338_s14  ;;  %p37_p8 = scmp.ne.s32.totalorder %s2152_s20, %s2148_s19 }
  0x56   : > { %p28_p4 = scmp.eq.s32.totalorder %s27_s29, 0  ;;  %p38_p13 = scmp.eq.s32.totalorder %s2156_s21, 0 }
  0x57   : > { %p1915_p6 = scmp.lt.s32.totalorder %s2156_s21, 2  ;;  %p2575_p3 = scmp.eq.s32.totalorder %s2219_s22, 1 }
  0x58   : > { %s2348_s30 = scalar_select %p28_p4, %s2152_s20, %s30_s17  }
  0x59   : > { %p39_p10 = por %p38_p13, %p37_p8  ;;  %p2352_p5 = por %p2575_p3, %p37_p8 }
  0x5a   : > { %s219_s9 = sand.u32 1, %s2152_s20   ;;  %s1418_s10 = sshll.u32 %s2156_s21, 8 }
  0x5b   : > { %s1378_s8 = sshll.u32 %s219_s9, 4  ;;  %s2361_s13 = scalar_lea.hbm %s2561_s0, %s1418_s10 }
  0x5c   : > { %s223_s15 = scalar_lea.vmem [#allocation3], %s1378_s8  ;;  %p2363_p11 = pnand %p1915_p6, %p39_p10 }
  0x5d   : > { %s230_s16 = sshll.u32 %s223_s15, 4  ;;  %s2369_s28 = scalar_lea.sflag [#allocation4], %s219_s9  ;;  %s2367_s16 = int_to_ptr.vmem [resolvable:$true] %s230_s16 }
  0x5e   : > { %s2052_s29 = scalar_lea.hbm %s2361_s13, 256  ;;  %p2054_p9 = pneg %p2363_p11 }
  0x5f   : > { %p2053_p7 = scmp.ne.s32.totalorder %s2361_s13, %s2052_s29  ;;  %s2057_s8 = scalar_lea.hbm %s2561_s0, 512 }
  0x60   : > { %p2058_p1 = scmp.lt.u32.totalorder %s2361_s13, %s2561_s0  ;;  %p2059_p2 = scmp.lt.u32.totalorder %s2057_s8, %s2052_s29 }
  0x61   : > { %p2055_p12 = pnand %p2054_p9, %p2053_p7  ;;  %p2061_p8 = scmp.lt.u32.totalorder %s2052_s29, %s2361_s13 }
  0x62   : > { %p2060_p4 = por %p2059_p2, %p2058_p1 }
  0x63   : > { %p2056_p0 = pneg %p2055_p12 }
  0x64   : > { %p2062_p13 = por %p2061_p8, %p2060_p4 }
  0x66   : > { %p2063_p6 = pnand %p2062_p13, %p2056_p0 }
  0x68   : > { %2066 = shalt.err (!%p2063_p6)
}
  0x69   : > { %s2067_s9 = scalar_lea.vmem %s2367_s16, 256  ;;  %s2163_s15 = smov [#allocation3]  }
  0x6a   : > { %p2068_p10 = scmp.ne.s32.totalorder %s2367_s16, %s2067_s9  ;;  %s2072_s17 = sshll.u32 %s2163_s15, 4  ;;  %s2073_s17 = int_to_ptr.vmem [resolvable:$false] %s2072_s17 }
  0x6b   : > { %s2074_s10 = scalar_lea.vmem %s2073_s17, 512  ;;  %p2075_p12 = scmp.lt.s32.totalorder %s2367_s16, %s2073_s17 }
  0x6c   : > { %p2070_p3 = pnand %p2068_p10, %p2054_p9  ;;  %p2076_p1 = scmp.lt.s32.totalorder %s2074_s10, %s2067_s9 }
  0x6e   : > { %p2071_p7 = pneg %p2070_p3  ;;  %p2077_p2 = por %p2076_p1, %p2075_p12 }
  0x70   : > { %p2078_p4 = pnand %p2077_p2, %p2071_p7 }
  0x72   : > { %2081 = shalt.err (!%p2078_p4)
}
  0x73   : > { %1907 = dma.hbm_to_vmem [thread:$0]  (!%p2363_p11), %s2361_s13, 256, %s2367_s16, %s2369_s28, %s2161_s23, %s2161_s23, %s2162_s27  }
  0x74   : > { %p2578_p9 = scmp.ne.s32.totalorder %s2572_s26, 0 }
  0x75   : > { %s2403_s29 = sand.u32 (!%p2578_p9), 1, %s2148_s19   ;;  %p2579_p0 = scmp.ne.s32.totalorder (!%p2578_p9), %s2570_s24, 0 }
  0x76   : > { %242 = sbr.rel (%p2578_p9) target bundleno = 1576 (0x628), region = 40  ;;  %s1382_s8 = sshll.u32 (!%p2578_p9), %s2403_s29, 4 }
  0x77   : > { %s245_s11 = scalar_lea.sflag (!%p2578_p9), [#allocation4], %s2403_s29  ;;  %s248_s6 = scalar_lea.vmem (!%p2578_p9), [#allocation3], %s1382_s8 }
  0x7d   : > { %2127 = dma.done.wait (%p2579_p0), %s245_s11, 256  }
  0x7e   : > { %2129 = vsyncadd (%p2579_p0), %s245_s11, 4294967040  ;;  %p2580_p11 = scmp.eq.s32.totalorder %s2219_s22, 0 }
  0x80   : > { %2131 = dma.done.wait (%p2580_p11), [#allocation7], 6144   ;;  %p2581_p8 = pmov %p2580_p11 }
  0x82   : > { %2133 = vsyncadd (%p2581_p8), [#allocation7], 4294961152  ;;  %p2582_p13 = pmov %p2581_p8 }
  0x83   : > { %p2583_p6 = pmov %p2581_p8 }
  0x84   : > { %2135 = dma.done.wait (%p2582_p13), [#allocation10], 2048  }
  0x85   : > { %2137 = vsyncadd (%p2583_p6), [#allocation10], 4294965248  ;;  %vm289_vm0 = vcmask 516096   ;;  %v2164_v0 = vmov 0.0   ;;  %v326_v1 = vld [vmem:[#allocation6 + $0x40] sm:$0xff]  ;;  %v327_v2 = vld [vmem:[#allocation6 + $0x48] sm:$0xff] }
  0x86   : > { %290 = vst.msk [vmem:[#allocation2] sm:$0x1] %vm289_vm0, %v2164_v0  ;;  %291 = vst.msk [vmem:[#allocation2 + $0x11] sm:$0x1] %vm289_vm0, %v2164_v0  ;;  %v328_v3 = vld [vmem:[#allocation6 + $0x50] sm:$0xff]  ;;  %vm292_vm1 = vcmask 523264   ;;  %v1710_v4 = vpack.c.bf16 %v327_v2, %v326_v1 }
  0x87   : > { %v329_v5 = vld [vmem:[#allocation6 + $0x58] sm:$0xff]  ;;  %v330_v7 = vld [vmem:[#allocation6 + $0x60] sm:$0xff]  ;;  %v331_v8 = vld [vmem:[#allocation6 + $0x68] sm:$0xff]  ;;  %s1419_s11 = sshll.u32 %s2219_s22, 8  ;;  %s1257_s22 = scalar_lea.sflag [#allocation5], %s2403_s29 }
  0x88   : > { %v1714_v6 = vpack.c.bf16 %v329_v5, %v328_v3  ;;  %v2421_v9 = vld [vmem:[%s248_s6] sm:$0xff]  ;;  %1711 = vmatprep.subr.bf16.mxu0 %v1710_v4  ;;  %v2425_v10 = vld [vmem:[%s248_s6 + $0x8] sm:$0xff]  ;;  %v1718_v11 = vpack.c.bf16 %v331_v8, %v330_v7  ;;  %s286_s6 = scalar_lea.vmem [#allocation11], %s1382_s8  ;;  %s2512_s27 = scalar_lea.hbm %s2566_s5, %s1419_s11 }
  0x89   : > { %293 = vst.msk [vmem:[#allocation2 + $0x1] sm:$0xff] %vm292_vm1, %v2421_v9  ;;  %1713 = vmatpush3.bf16.msra.mxu0 %v1710_v4  ;;  %294 = vst.msk [vmem:[#allocation2 + $0x9] sm:$0xff] %vm292_vm1, %v2425_v10  ;;  %v332_v12 = vld [vmem:[#allocation6 + $0x70] sm:$0xff]  ;;  %v333_v13 = vld [vmem:[#allocation6 + $0x78] sm:$0xff]  ;;  %s1270_s24 = sshll.u32 %s286_s6, 4  ;;  %s2165_s13 = smov [#allocation11]   ;;  %s2514_s24 = int_to_ptr.vmem [resolvable:$true] %s1270_s24 }
  0x8a   : > { %1715 = vmatprep.subr.bf16.mxu0 %v1714_v6  ;;  %v295_v14 = vld [vmem:[#allocation9] sm:$0xff]  ;;  %v1722_v15 = vpack.c.bf16 %v333_v13, %v332_v12  ;;  %v296_v16 = vld [vmem:[#allocation9 + $0x8] sm:$0xff]  ;;  %v297_v17 = vld [vmem:[#allocation9 + $0x10] sm:$0xff]  ;;  %s2082_s8 = scalar_lea.vmem %s2514_s24, 256  ;;  %s2086_s16 = sshll.u32 %s2165_s13, 4  ;;  %s2087_s16 = int_to_ptr.vmem [resolvable:$false] %s2086_s16 }
  0x8b   : > { %v298_v18 = vld [vmem:[#allocation9 + $0x18] sm:$0xff]  ;;  %v315_v20 = vld [vmem:[#allocation6] sm:$0xff]  ;;  %v316_v21 = vld [vmem:[#allocation6 + $0x8] sm:$0xff]  ;;  %v2429_v22 = vpack.c.bf16 %v296_v16, %v295_v14  ;;  %p2083_p10 = scmp.ne.s32.totalorder %s2514_s24, %s2082_s8  ;;  %s2088_s28 = scalar_lea.vmem %s2087_s16, 512 }
  0x8c   : > { %v2431_v23 = vpack.c.bf16 %v298_v18, %v297_v17  ;;  %v299_v24 = vld [vmem:[#allocation9 + $0x20] sm:$0xff]  ;;  %v300_v25 = vld [vmem:[#allocation9 + $0x28] sm:$0xff]  ;;  %v1726_v26 = vpack.c.bf16 %v316_v21, %v315_v20  ;;  %v317_v27 = vld [vmem:[#allocation6 + $0x10] sm:$0xff]  ;;  %p2089_p12 = scmp.lt.s32.totalorder %s2514_s24, %s2087_s16  ;;  %p2090_p1 = scmp.lt.s32.totalorder %s2088_s28, %s2082_s8 }
  0x8d   : > { %1717 = vmatpush3.bf16.msra.mxu0 %v1714_v6  ;;  %1759 = vmatprep.subr.bf16.mxu1 %v2429_v22  ;;  %v318_v28 = vld [vmem:[#allocation6 + $0x18] sm:$0xff]  ;;  %v1766_v29 = vpack.c.bf16 %v300_v25, %v299_v24  ;;  %v319_v33 = vld [vmem:[#allocation6 + $0x20] sm:$0xff]  ;;  %v320_v34 = vld [vmem:[#allocation6 + $0x28] sm:$0xff]  ;;  %p2084_p3 = pnand %p2083_p10, %p2352_p5 }
  0x8e   : > { %1719 = vmatprep.subr.bf16.mxu0 %v1718_v11  ;;  %1761 = vmatpush3.bf16.msra.mxu1 %v2429_v22  ;;  %v1730_v31 = vpack.c.bf16 %v318_v28, %v317_v27  ;;  %v1734_v35 = vpack.c.bf16 %v320_v34, %v319_v33  ;;  %v321_v36 = vld [vmem:[#allocation6 + $0x30] sm:$0xff]  ;;  %v322_v37 = vld [vmem:[#allocation6 + $0x38] sm:$0xff]  ;;  %v499_v39 = vld [vmem:[#allocation6 + $0x80] sm:$0xff]  ;;  %p2091_p2 = por %p2090_p1, %p2089_p12 }
  0x8f   : > { %1763 = vmatprep.subr.bf16.mxu1 %v2431_v23  ;;  %v1738_v38 = vpack.c.bf16 %v322_v37, %v321_v36  ;;  %v500_v40 = vld [vmem:[#allocation6 + $0x88] sm:$0xff]  ;;  %v501_v42 = vld [vmem:[#allocation6 + $0x90] sm:$0xff]  ;;  %v502_v43 = vld [vmem:[#allocation6 + $0x98] sm:$0xff]  ;;  %p2085_p7 = pneg %p2084_p3 }
  0x90   : > { %v323_v19 = vld [vmem:[#allocation2 + $0x1] sm:$0xff]  ;;  %v324_v30 = vld [vmem:[#allocation2 + $0x9] sm:$0xff]  ;;  %v1742_v41 = vpack.c.bf16 %v500_v40, %v499_v39  ;;  %v1746_v45 = vpack.c.bf16 %v502_v43, %v501_v42  ;;  %v503_v47 = vld [vmem:[#allocation6 + $0xa0] sm:$0xff] }
  0x91   : > { %1536 = vmatprep.mubr.msk.f32.mxu0 %vm292_vm1, %v323_v19  ;;  %1721 = vmatpush3.bf16.msra.mxu0 %v1718_v11  ;;  %v313_v32 = vld [vmem:[#allocation2] sm:$0xff]  ;;  %v314_v44 = vld [vmem:[#allocation2 + $0x8] sm:$0xff]  ;;  %v506_v51 = vld [vmem:[#allocation6 + $0xb8] sm:$0xff]  ;;  %p2092_p4 = pnand %p2091_p2, %p2085_p7 }
  0x92   : > { %1723 = vmatprep.subr.bf16.mxu0 %v1722_v15  ;;  %1765 = vmatpush3.bf16.msra.mxu1 %v2431_v23  ;;  %v496_v46 = vld [vmem:[#allocation2 + $0x2] sm:$0xff]  ;;  %v497_v53 = vld [vmem:[#allocation2 + $0xa] sm:$0xff]  ;;  %v304_v57 = vld [vmem:[#allocation9 + $0x40] sm:$0xff] }
  0x93   : > { %1767 = vmatprep.subr.bf16.mxu1 %v1766_v29  ;;  %v504_v48 = vld [vmem:[#allocation6 + $0xa8] sm:$0xff]  ;;  %v505_v50 = vld [vmem:[#allocation6 + $0xb0] sm:$0xff]  ;;  %v302_v55 = vld [vmem:[#allocation9 + $0x38] sm:$0xff] }
  0x94   : > { %v1750_v49 = vpack.c.bf16 %v504_v48, %v503_v47  ;;  %v1754_v52 = vpack.c.bf16 %v506_v51, %v505_v50  ;;  %v301_v54 = vld [vmem:[#allocation9 + $0x30] sm:$0xff]  ;;  %v305_v58 = vld [vmem:[#allocation9 + $0x48] sm:$0xff]  ;;  %v307_v63 = vld [vmem:[#allocation9 + $0x58] sm:$0xff] }
  0x95   : > { %1725 = vmatpush3.bf16.msra.mxu0 %v1722_v15  ;;  %v1770_v56 = vpack.c.bf16 %v302_v55, %v301_v54  ;;  %v2447_v59 = vpack.c.bf16 %v305_v58, %v304_v57  ;;  %v1393_v60 = vld [vmem:[%s2564_s3] ss:$0 sm:$0xff]  ;;  %v306_v62 = vld [vmem:[#allocation9 + $0x50] sm:$0xff]  ;;  %v308_v4 = vld [vmem:[#allocation9 + $0x60] sm:$0xff] }
  0x96   : > { %1727 = vmatprep.subr.bf16.mxu0 %v1726_v26  ;;  %1769 = vmatpush3.bf16.msra.mxu1 %v1766_v29  ;;  %v2454_v3 = vpack.c.bf16 %v307_v63, %v306_v62  ;;  %v309_v5 = vld [vmem:[#allocation9 + $0x68] sm:$0xff]  ;;  %v310_v7 = vld [vmem:[#allocation9 + $0x70] sm:$0xff]  ;;  %v311_v8 = vld [vmem:[#allocation9 + $0x78] sm:$0xff] }
  0x97   : > { %1771 = vmatprep.subr.bf16.mxu1 %v1770_v56  ;;  %v2460_v6 = vpack.c.bf16 %v309_v5, %v308_v4  ;;  %v2465_v11 = vpack.c.bf16 %v311_v8, %v310_v7  ;;  %v798_v18 = vld [vmem:[#allocation8 + $0x40] sm:$0xff]  ;;  %v799_v19 = vld [vmem:[#allocation8 + $0x48] sm:$0xff]  ;;  %v800_v21 = vld [vmem:[#allocation8 + $0x50] sm:$0xff] }
  0x98   : > { %1537 = vmatmul.mubr.msk.f32.vlgmr.msra.gmra.mrb[0].mxu0 %vm292_vm1, %v324_v30  ;;  %v1790_v20 = vpack.c.bf16 %v799_v19, %v798_v18  ;;  %v802_v24 = vld [vmem:[#allocation8 + $0x60] sm:$0xff]  ;;  %v803_v25 = vld [vmem:[#allocation8 + $0x68] sm:$0xff]  ;;  %v804_v27 = vld [vmem:[#allocation8 + $0x70] sm:$0xff] }
  0x99   : > { %1729 = vmatpush3.bf16.msra.mxu0 %v1726_v26  ;;  %1555 = vmatprep.mubr.msk.f32.mxu0 %vm292_vm1, %v313_v32  ;;  %v1798_v26 = vpack.c.bf16 %v803_v25, %v802_v24  ;;  %v805_v28 = vld [vmem:[#allocation8 + $0x78] sm:$0xff]  ;;  %v787_v30 = vld [vmem:[#allocation8] sm:$0xff]  ;;  %v792_v55 = vld [vmem:[#allocation8 + $0x28] sm:$0xff] }
  0x9a   : > { %1731 = vmatprep.subr.bf16.mxu0 %v1730_v31  ;;  %1773 = vmatpush3.bf16.msra.mxu1 %v1770_v56  ;;  %v790_v50 = vld [vmem:[#allocation8 + $0x18] sm:$0xff]  ;;  %v791_v54 = vld [vmem:[#allocation8 + $0x20] sm:$0xff]  ;;  %v793_v58 = vld [vmem:[#allocation8 + $0x30] sm:$0xff] }
  0x9b   : > { %1775 = vmatprep.subr.bf16.mxu1 %v2447_v59  ;;  %v1814_v57 = vpack.c.bf16 %v792_v55, %v791_v54  ;;  %v971_v62 = vld [vmem:[#allocation8 + $0x80] sm:$0xff]  ;;  %v972_v63 = vld [vmem:[#allocation8 + $0x88] sm:$0xff] }
  0x9c   : > { %v975_v7 = vld [vmem:[#allocation8 + $0xa0] sm:$0xff]  ;;  %v976_v8 = vld [vmem:[#allocation8 + $0xa8] sm:$0xff] }
  0x9d   : > { %1733 = vmatpush3.bf16.msra.mxu0 %v1730_v31  ;;  %v788_v31 = vld [vmem:[#allocation8 + $0x8] sm:$0xff] }
  0x9e   : > { %1735 = vmatprep.subr.bf16.mxu0 %v1734_v35  ;;  %v1806_v32 = vpack.c.bf16 %v788_v31, %v787_v30  ;;  %v1406_v18 = vld [vmem:[%s2564_s3 + $0x3] ss:$0 sm:$0xff] }
  0xa1   : > { %1737 = vmatpush3.bf16.msra.mxu0 %v1734_v35 }
  0xa2   : > { %1739 = vmatprep.subr.bf16.mxu0 %v1738_v38 }
  0xa5   : > { %1741 = vmatpush3.bf16.msra.mxu0 %v1738_v38  ;;  %v1398_v38 = vld [vmem:[%s2564_s3 + $0x1] ss:$0 sm:$0xff] }
  0xa6   : > { %1743 = vmatprep.subr.bf16.mxu0 %v1742_v41 }
  0xa8   : > { %1556 = vmatmul.mubr.msk.f32.vlgmr.msra.gmra.mrb[0].mxu0 %vm292_vm1, %v314_v44 }
  0xa9   : > { %1745 = vmatpush3.bf16.msra.mxu0 %v1742_v41  ;;  %1574 = vmatprep.mubr.msk.f32.mxu0 %vm292_vm1, %v496_v46  ;;  %v1399_v41 = vld [vmem:[%s2564_s3 + $0x2] ss:$0 sm:$0xff] }
  0xaa   : > { %1747 = vmatprep.subr.bf16.mxu0 %v1746_v45 }
  0xad   : > { %1749 = vmatpush3.bf16.msra.mxu0 %v1746_v45 }
  0xae   : > { %1751 = vmatprep.subr.bf16.mxu0 %v1750_v49 }
  0xb1   : > { %1753 = vmatpush3.bf16.msra.mxu0 %v1750_v49  ;;  %v789_v49 = vld [vmem:[#allocation8 + $0x10] sm:$0xff] }
  0xb2   : > { %1755 = vmatprep.subr.bf16.mxu0 %v1754_v52 }
  0xb5   : > { %1757 = vmatpush3.bf16.msra.mxu0 %v1754_v52  ;;  %v1810_v52 = vpack.c.bf16 %v790_v50, %v789_v49 }
  0xb6   : > { %1839 = vmatprep.subr.bf16.mxu0 %v2429_v22 }
  0xb8   : > { %1575 = vmatmul.mubr.msk.f32.vlgmr.msra.gmra.mrb[0].mxu0 %vm292_vm1, %v497_v53 }
  0xb9   : > { %1841 = vmatpush3.bf16.msra.mxu0 %v2429_v22  ;;  %v801_v22 = vld [vmem:[#allocation8 + $0x58] sm:$0xff] }
  0xba   : > { %1843 = vmatprep.subr.bf16.mxu0 %v2431_v23 }
  0xbd   : > { %1845 = vmatpush3.bf16.msra.mxu0 %v2431_v23  ;;  %v1794_v23 = vpack.c.bf16 %v801_v22, %v800_v21 }
  0xbe   : > { %1847 = vmatprep.subr.bf16.mxu0 %v1766_v29 }
  0xc1   : > { %1849 = vmatpush3.bf16.msra.mxu0 %v1766_v29  ;;  %v1802_v29 = vpack.c.bf16 %v805_v28, %v804_v27 }
  0xc2   : > { %1851 = vmatprep.subr.bf16.mxu0 %v1770_v56 }
  0xc5   : > { %1853 = vmatpush3.bf16.msra.mxu0 %v1770_v56 }
  0xc6   : > { %1855 = vmatprep.subr.bf16.mxu0 %v2447_v59 }
 0x18b   : > { %v1576_v61 = vpop.f32.mrb[0].mxu0 }
 0x18c   : > { %v579_v0 = vpop.f32.mrb[1].mxu0  ;;  %v595_v2 = vadd.f32 %v1576_v61, %v1393_v60 }
 0x18d   : > { %v594_v1 = vadd.f32 %v1393_v60, %v579_v0  ;;  %v794_v60 = vld [vmem:[#allocation8 + $0x38] sm:$0xff]  ;;  %v1822_v0 = vpack.c.bf16 %v972_v63, %v971_v62 }
 0x18e   : > { %v1818_v61 = vpack.c.bf16 %v794_v60, %v793_v58 }
 0x18f   : > { %1593 = vmatprep.mubr.msk.f32.mxu1 %vm292_vm1, %v594_v1 }
 0x190   : > { %1594 = vmatmul.mubr.msk.f32.vlgmr.msra.gmra.mrb[0].mxu1 %vm292_vm1, %v595_v2 }
 0x191   : > { %1777 = vmatpush3.bf16.msra.mxu1 %v2447_v59 }
 0x192   : > { %1779 = vmatprep.subr.bf16.mxu1 %v2454_v3 }
 0x195   : > { %1781 = vmatpush3.bf16.msra.mxu1 %v2454_v3 }
 0x196   : > { %1783 = vmatprep.subr.bf16.mxu1 %v2460_v6 }
 0x199   : > { %1785 = vmatpush3.bf16.msra.mxu1 %v2460_v6 }
 0x19a   : > { %1787 = vmatprep.subr.bf16.mxu1 %v2465_v11 }
 0x19d   : > { %1789 = vmatpush3.bf16.msra.mxu1 %v2465_v11 }
 0x19e   : > { %1791 = vmatprep.subr.bf16.mxu1 %v1790_v20 }
 0x263   : > { %v1595_v12 = vpop.f32.mrb[0].mxu1 }
 0x264   : > { %v680_v13 = vsub.f32 %v595_v2, %v1595_v12  ;;  %v670_v14 = vpop.f32.mrb[1].mxu1  ;;  %v974_v2 = vld [vmem:[#allocation8 + $0x98] sm:$0xff] }
 0x265   : > { %v679_v15 = vsub.f32 %v594_v1, %v670_v14  ;;  %v973_v1 = vld [vmem:[#allocation8 + $0x90] sm:$0xff] }
 0x266   : > { %v682_v17 = vmul.f32 %v680_v13, %v680_v13  ;;  %v1826_v4 = vpack.c.bf16 %v974_v2, %v973_v1  ;;  %v977_v14 = vld [vmem:[#allocation8 + $0xb0] sm:$0xff] }
 0x267   : > { %v681_v16 = vmul.f32 %v679_v15, %v679_v15 }
 0x269   : > { %1612 = vmatprep.mubr.msk.f32.mxu1 %vm292_vm1, %v681_v16 }
 0x26a   : > { %1613 = vmatmul.mubr.msk.f32.vlgmr.msra.gmra.mrb[2].mxu1 %vm292_vm1, %v682_v17 }
 0x26b   : > { %1793 = vmatpush3.bf16.msra.mxu1 %v1790_v20 }
 0x26c   : > { %1795 = vmatprep.subr.bf16.mxu1 %v1794_v23 }
 0x26f   : > { %1797 = vmatpush3.bf16.msra.mxu1 %v1794_v23 }
 0x270   : > { %1799 = vmatprep.subr.bf16.mxu1 %v1798_v26 }
 0x273   : > { %1801 = vmatpush3.bf16.msra.mxu1 %v1798_v26 }
 0x274   : > { %1803 = vmatprep.subr.bf16.mxu1 %v1802_v29 }
 0x277   : > { %1805 = vmatpush3.bf16.msra.mxu1 %v1802_v29 }
 0x278   : > { %1807 = vmatprep.subr.bf16.mxu1 %v1806_v32 }
 0x33d   : > { %v1614_v33 = vpop.f32.mrb[2].mxu1 }
 0x33e   : > { %v761_v34 = vadd.f32 0.001, %v1614_v33  ;;  %v755_v35 = vpop.f32.mrb[3].mxu1  ;;  %v1412_v33 = vld [vmem:[%s2564_s3 + $0x5] ss:$0 sm:$0xff] }
 0x33f   : > { %v756_v36 = vadd.f32 0.001, %v755_v35 }
 0x340   : > { %1960 = vrsqrt.f32 %v761_v34 }
 0x341   : > { %1962 = vrsqrt.f32 %v756_v36 }
 0x34a   : > { %v1961_v37 = vpop.eup %1960 }
 0x34b   : > { %v1963_v39 = vpop.eup %1962  ;;  %v767_v40 = vmul.f32 %v1961_v37, %v680_v13  ;;  %v1830_v13 = vpack.c.bf16 %v976_v8, %v975_v7 }
 0x34c   : > { %v766_v42 = vmul.f32 %v1963_v39, %v679_v15  ;;  %v978_v15 = vld [vmem:[#allocation8 + $0xb8] sm:$0xff] }
 0x34d   : > { %v773_v43 = vmul.f32 %v1398_v38, %v767_v40  ;;  %v1834_v16 = vpack.c.bf16 %v978_v15, %v977_v14 }
 0x34e   : > { %v772_v44 = vmul.f32 %v1398_v38, %v766_v42 }
 0x34f   : > { %v779_v45 = vadd.f32 %v1399_v41, %v773_v43 }
 0x350   : > { %v778_v46 = vadd.f32 %v1399_v41, %v772_v44 }
 0x351   : > { %v781_v47 = vmax.f32 %v779_v45, 0.0 }
 0x352   : > { %v780_v48 = vmax.f32 %v778_v46, 0.0 }
 0x353   : > { %783 = vst.msk [vmem:[#allocation2 + $0x9] sm:$0xff] %vm292_vm1, %v781_v47 }
 0x354   : > { %782 = vst.msk [vmem:[#allocation2 + $0x1] sm:$0xff] %vm292_vm1, %v780_v48 }
 0x35a   : > { %v796_v53 = vld [vmem:[#allocation2 + $0x9] sm:$0xff] }
 0x35b   : > { %v795_v51 = vld [vmem:[#allocation2 + $0x1] sm:$0xff]  ;;  %v969_v17 = vld [vmem:[#allocation2 + $0xa] sm:$0xff] }
 0x35c   : > { %1631 = vmatprep.mubr.msk.f32.mxu1 %vm292_vm1, %v795_v51  ;;  %v785_v56 = vld [vmem:[#allocation2] sm:$0xff]  ;;  %v786_v5 = vld [vmem:[#allocation2 + $0x8] sm:$0xff] }
 0x35d   : > { %1632 = vmatmul.mubr.msk.f32.vlgmr.msra.gmra.mrb[4].mxu1 %vm292_vm1, %v796_v53  ;;  %v968_v12 = vld [vmem:[#allocation2 + $0x2] sm:$0xff] }
 0x35e   : > { %1809 = vmatpush3.bf16.msra.mxu1 %v1806_v32  ;;  %1650 = vmatprep.mubr.msk.f32.mxu1 %vm292_vm1, %v785_v56 }
 0x35f   : > { %1811 = vmatprep.subr.bf16.mxu1 %v1810_v52 }
 0x362   : > { %1813 = vmatpush3.bf16.msra.mxu1 %v1810_v52 }
 0x363   : > { %1815 = vmatprep.subr.bf16.mxu1 %v1814_v57 }
 0x366   : > { %1817 = vmatpush3.bf16.msra.mxu1 %v1814_v57 }
 0x367   : > { %1819 = vmatprep.subr.bf16.mxu1 %v1818_v61 }
 0x36a   : > { %1821 = vmatpush3.bf16.msra.mxu1 %v1818_v61 }
 0x36b   : > { %1823 = vmatprep.subr.bf16.mxu1 %v1822_v0 }
 0x36d   : > { %1651 = vmatmul.mubr.msk.f32.vlgmr.msra.gmra.mrb[4].mxu1 %vm292_vm1, %v786_v5 }
 0x36e   : > { %1825 = vmatpush3.bf16.msra.mxu1 %v1822_v0  ;;  %1669 = vmatprep.mubr.msk.f32.mxu1 %vm292_vm1, %v968_v12 }
 0x36f   : > { %1827 = vmatprep.subr.bf16.mxu1 %v1826_v4 }
 0x372   : > { %1829 = vmatpush3.bf16.msra.mxu1 %v1826_v4 }
 0x373   : > { %1831 = vmatprep.subr.bf16.mxu1 %v1830_v13 }
 0x376   : > { %1833 = vmatpush3.bf16.msra.mxu1 %v1830_v13 }
 0x377   : > { %1835 = vmatprep.subr.bf16.mxu1 %v1834_v16 }
 0x37a   : > { %1837 = vmatpush3.bf16.msra.mxu1 %v1834_v16 }
 0x37d   : > { %1670 = vmatmul.mubr.msk.f32.vlgmr.msra.gmra.mrb[4].mxu1 %vm292_vm1, %v969_v17 }
 0x450   : > { %v1671_v19 = vpop.f32.mrb[4].mxu1 }
 0x451   : > { %v1051_v20 = vpop.f32.mrb[5].mxu1  ;;  %v1067_v22 = vadd.f32 %v1671_v19, %v1406_v18 }
 0x452   : > { %v1066_v21 = vadd.f32 %v1406_v18, %v1051_v20 }
 0x454   : > { %1688 = vmatprep.mubr.msk.f32.mxu0 %vm292_vm1, %v1066_v21 }
 0x455   : > { %1689 = vmatmul.mubr.msk.f32.vlgmr.msra.gmra.mrb[2].mxu0 %vm292_vm1, %v1067_v22 }
 0x456   : > { %1857 = vmatpush3.bf16.msra.mxu0 %v2447_v59 }
 0x457   : > { %1859 = vmatprep.subr.bf16.mxu0 %v2454_v3 }
 0x45a   : > { %1861 = vmatpush3.bf16.msra.mxu0 %v2454_v3 }
 0x45b   : > { %1863 = vmatprep.subr.bf16.mxu0 %v2460_v6 }
 0x45e   : > { %1865 = vmatpush3.bf16.msra.mxu0 %v2460_v6 }
 0x45f   : > { %1867 = vmatprep.subr.bf16.mxu0 %v2465_v11 }
 0x462   : > { %1869 = vmatpush3.bf16.msra.mxu0 %v2465_v11  ;;  %v1411_v11 = vld [vmem:[%s2564_s3 + $0x4] ss:$0 sm:$0xff] }
 0x528   : > { %v1690_v23 = vpop.f32.mrb[2].mxu0 }
 0x529   : > { %v1152_v24 = vsub.f32 %v1067_v22, %v1690_v23  ;;  %v1142_v25 = vpop.f32.mrb[3].mxu0 }
 0x52a   : > { %v1151_v26 = vsub.f32 %v1066_v21, %v1142_v25 }
 0x52b   : > { %v1154_v28 = vmul.f32 %v1152_v24, %v1152_v24 }
 0x52c   : > { %v1153_v27 = vmul.f32 %v1151_v26, %v1151_v26 }
 0x52e   : > { %1707 = vmatprep.mubr.msk.f32.mxu0 %vm292_vm1, %v1153_v27 }
 0x52f   : > { %1708 = vmatmul.mubr.msk.f32.vlgmr.msra.gmra.mrb[4].mxu0 %vm292_vm1, %v1154_v28 }
 0x602   : > { %v1709_v59 = vpop.f32.mrb[4].mxu0 }
 0x603   : > { %v1233_v3 = vadd.f32 0.001, %v1709_v59  ;;  %v1227_v29 = vpop.f32.mrb[5].mxu0 }
 0x604   : > { %v1228_v6 = vadd.f32 0.001, %v1227_v29 }
 0x605   : > { %1964 = vrsqrt.f32 %v1233_v3 }
 0x606   : > { %1966 = vrsqrt.f32 %v1228_v6 }
 0x60f   : > { %v1965_v30 = vpop.eup %1964 }
 0x610   : > { %v1967_v31 = vpop.eup %1966  ;;  %v1239_v32 = vmul.f32 %v1965_v30, %v1152_v24 }
 0x611   : > { %v1238_v34 = vmul.f32 %v1967_v31, %v1151_v26 }
 0x612   : > { %v1245_v35 = vmul.f32 %v1411_v11, %v1239_v32 }
 0x613   : > { %v1244_v36 = vmul.f32 %v1411_v11, %v1238_v34 }
 0x614   : > { %v1251_v37 = vadd.f32 %v1412_v33, %v1245_v35 }
 0x615   : > { %v1250_v38 = vadd.f32 %v1412_v33, %v1244_v36 }
 0x616   : > { %v1253_v39 = vadd.f32 %v1251_v37, %v2425_v10 }
 0x617   : > { %v1252_v40 = vadd.f32 %v1250_v38, %v2421_v9 }
 0x618   : > { %1255 = vst.msk [vmem:[%s286_s6 + $0x8] sm:$0xff] %vm292_vm1, %v1253_v39 }
 0x619   : > { %1254 = vst.msk [vmem:[%s286_s6] sm:$0xff] %vm292_vm1, %v1252_v40 }
 0x61a   : > { %2095 = shalt.err (!%p2092_p4)
}
 0x61b   : > { %s2096_s12 = scalar_lea.hbm %s2512_s27, 256  ;;  %s2100_s17 = scalar_lea.hbm %s2566_s5, 512 }
 0x61c   : > { %p2097_p9 = scmp.ne.s32.totalorder %s2512_s27, %s2096_s12  ;;  %p2101_p8 = scmp.lt.u32.totalorder %s2512_s27, %s2566_s5 }
 0x61d   : > { %p2102_p13 = scmp.lt.u32.totalorder %s2100_s17, %s2096_s12  ;;  %p2104_p10 = scmp.lt.u32.totalorder %s2096_s12, %s2512_s27 }
 0x61e   : > { %p2098_p0 = pnand %p2097_p9, %p2352_p5 }
 0x61f   : > { %p2103_p6 = por %p2102_p13, %p2101_p8 }
 0x620   : > { %p2099_p11 = pneg %p2098_p0 }
 0x621   : > { %p2105_p3 = por %p2104_p10, %p2103_p6 }
 0x623   : > { %p2106_p7 = pnand %p2105_p3, %p2099_p11 }
 0x625   : > { %2109 = shalt.err (!%p2106_p7)
}
 0x626   : > { %s2166_s6 = smov 128   ;;  %s2167_s26 = smov 8  }
 0x627   : > { %1892 = dma.vmem_to_hbm [thread:$0]  (%p2352_p5), %s2514_s24, 256, %s2512_s27, %s1257_s22, %s2166_s6, %s2166_s6, %s2167_s26  }
 0x628 PF: > { %s1285_s23 = sand.u32 1, %s2144_s18   ;;  %p2584_p12 = scmp.ne.s32.totalorder %s2571_s25, 0 }
 0x629   : > { %p2585_p1 = scmp.ge.s32.totalorder %s2156_s21, 2  ;;  %s1286_s8 = scalar_lea.sflag [#allocation5], %s1285_s23 }
 0x62b   : > { %p1909_p2 = pnand %p2585_p1, %p2584_p12 }
 0x62d   : > { %2139 = dma.done.wait (!%p1909_p2), %s1286_s8, 256  }
 0x62e   : > { %2141 = vsyncadd (!%p1909_p2), %s1286_s8, 4294967040  ;;  %p20_p4 = scmp.ge.s32.totalorder %s2338_s14, 4   ;;  %s2586_s18 = smov %s2148_s19 }
 0x62f   : > { %s2587_s19 = smov %s2152_s20  ;;  %s2588_s20 = smov %s2348_s30 }
 0x630   : > { %s2589_s21 = smov %s2338_s14  ;;  %22 = sbr.rel (!%p20_p4) target bundleno = 7 (0x7), region = 102 }
 0x637   :  { %1291 = vsyncpa [#allocation4], 1 }
 0x638   :  { %1293 = vsyncpa [#allocation4 + $0x1], 1 }
 0x639   :  { %1294 = vsyncpa [#allocation7], 1 }
 0x63a   :  { %1295 = vsyncpa [#allocation10], 1 }
 0x63b   :  { %1296 = vsyncpa [#allocation5], 1 }
 0x63c   :  { %1298 = vsyncpa [#allocation5 + $0x1], 1 }

</bundles_post_ra>
